<compile_context>
chip_gen: v5e
topology: v5e:2x2
jax: 0.10.0
libtpu: 0.0.40
codegen_flags: <defaults>
</compile_context>

<pallas_src>
import functools

import jax
import jax.numpy as jnp
from jax.experimental import pallas as pl
from jax.experimental.pallas import tpu as pltpu


def _round_up(x, m):
    return (x + m - 1) // m * m


def make_gru_kernel(T, Bp, H, Hp):
    """Single-invocation GRU kernel; all operand shapes pre-padded to TPU tiles."""

    def kernel(gx_ref, whh_ref, bhn_ref, wfc_ref, bfc_ref, out_ref):
        # gx_ref : (T*Bp, 3*Hp) f32   -- precomputed/gathered gate-table rows
        # whh_ref: (H, 3*Hp)   bf16   -- fused (r|z|n) hidden weights, K = H
        # bhn_ref: (1, Hp)     f32    -- n-gate hidden bias (scaled by r)
        # wfc_ref: (H, Op)     bf16   -- head weights, K = H
        # bfc_ref: (1, Op)     f32

        whh = whh_ref[...]                                        # ~6 bf16 vregs, resident
        bhn_b = jnp.broadcast_to(bhn_ref[...], (Bp, Hp))          # hoisted out of the loop

        # ---- serial recurrence, fully unrolled (static, small T) ----
        h = jnp.zeros((Bp, Hp), jnp.float32)
        for t in range(T):
            gx = gx_ref[t * Bp:(t + 1) * Bp, :]                   # (Bp, 3*Hp), per-step load
            gh = jnp.dot(h[:, :H].astype(jnp.bfloat16), whh,
                         preferred_element_type=jnp.float32)      # (Bp, 3*Hp), K = H only
            r = jax.nn.sigmoid(gx[:, 0:Hp] + gh[:, 0:Hp])
            z = jax.nn.sigmoid(gx[:, Hp:2 * Hp] + gh[:, Hp:2 * Hp])
            n = jnp.tanh(gx[:, 2 * Hp:3 * Hp] + r * (gh[:, 2 * Hp:3 * Hp] + bhn_b))
            h = n + z * (h - n)                                   # == (1-z)*n + z*h

        # ---- last-step linear head: lane-dense (Bp, Op) store ----
        out_ref[...] = (jnp.dot(h[:, :H].astype(jnp.bfloat16), wfc_ref[...],
                                preferred_element_type=jnp.float32)
                        + bfc_ref[...]).astype(out_ref.dtype)

    return kernel


def pack_params(params):
    """One-time weight packing (static w.r.t. inputs): fuse gates, fold biases,
    fold the embedding table into the input projection, pad to TPU tiles."""
    f32 = jnp.float32
    emb = params["embedding"].astype(f32)          # (V, E)
    wih, whh = params["wih"], params["whh"]        # (3, E, H), (3, H, H); gate order (r, z, n)
    bih, bhh = params["bih"], params["bhh"]        # (3, 1, H)
    wfc, bfc = params["wfc"], params["bfc"]        # (H, O), (1, O)

    E, H = wih.shape[1], wih.shape[2]
    O = wfc.shape[-1]
    Hp = _round_up(H, 128)                         # lane-pad hidden: each gate gets a 128-lane slot
    Op = _round_up(O, 128)                         # lane-pad output

    wih_f = jnp.zeros((E, 3 * Hp), f32)
    whh_f = jnp.zeros((H, 3 * Hp), f32)            # NOTE: only H real rows (K = H, no zero-pad rows)
    bx = jnp.zeros((1, 3 * Hp), f32)               # x-side biases; r/z also absorb b_hh
    for g in range(3):
        wih_f = wih_f.at[:, g * Hp:g * Hp + H].set(wih[g])
        whh_f = whh_f.at[:, g * Hp:g * Hp + H].set(whh[g])
        b = bih[g, 0] + (bhh[g, 0] if g < 2 else 0.0)
        bx = bx.at[0, g * Hp:g * Hp + H].set(b)

    # Embedding + input projection + folded bias precomputed once: (V, 3*Hp).
    gate_table = emb @ wih_f + bx

    bhn = jnp.zeros((1, Hp), f32).at[0, :H].set(bhh[2, 0])       # n-gate hidden bias
    wfc_p = jnp.zeros((H, Op), f32).at[:, :O].set(wfc)
    bfc_p = jnp.zeros((1, Op), f32).at[0, :O].set(bfc[0])

    return {
        "gate_table": gate_table,                  # (V, 3*Hp) f32
        "whh": whh_f.astype(jnp.bfloat16),         # (H, 3*Hp) bf16
        "bhn": bhn,                                # (1, Hp)   f32
        "wfc": wfc_p.astype(jnp.bfloat16),         # (H, Op)   bf16
        "bfc": bfc_p,                              # (1, Op)   f32
    }


@functools.partial(jax.jit, static_argnames=("out_dim",))
def gru_forward(x_idx, packed, *, out_dim):
    """x_idx: (B, T) int32 token ids -> (B, out_dim) logits."""
    B, T = x_idx.shape
    H = packed["whh"].shape[0]
    Hp = packed["bhn"].shape[1]
    Op = packed["bfc"].shape[1]
    Bp = _round_up(B, 8)                           # sublane-pad the batch

    # Gather the precomputed gate rows in time-major order, pad batch, flatten.
    gx = jnp.take(packed["gate_table"], jnp.transpose(x_idx), axis=0)   # (T, B, 3*Hp)
    gx = jnp.pad(gx, ((0, 0), (0, Bp - B), (0, 0))).reshape(T * Bp, 3 * Hp)

    vmem = pl.BlockSpec(memory_space=pltpu.MemorySpace.VMEM)
    out_p = pl.pallas_call(
        make_gru_kernel(T, Bp, H, Hp),
        out_shape=jax.ShapeDtypeStruct((Bp, Op), jnp.float32),
        in_specs=[vmem] * 5,
        out_specs=vmem,
    )(gx, packed["whh"], packed["bhn"], packed["wfc"], packed["bfc"])

    return out_p[:B, :out_dim]


def ref_forward(x_idx, params):
    """Pure-JAX f32 reference (mirrors torch nn.GRU semantics) for verification."""
    emb = jnp.take(params["embedding"], x_idx, axis=0).astype(jnp.float32)  # (B, T, E)
    B = emb.shape[0]
    H = params["whh"].shape[-1]
    h = jnp.zeros((B, H), jnp.float32)

    def step(h, x_t):
        gx = [x_t @ params["wih"][g] + params["bih"][g, 0] for g in range(3)]
        gh = [h @ params["whh"][g] + params["bhh"][g, 0] for g in range(3)]
        r = jax.nn.sigmoid(gx[0] + gh[0])
        z = jax.nn.sigmoid(gx[1] + gh[1])
        n = jnp.tanh(gx[2] + r * gh[2])
        h_new = (1.0 - z) * n + z * h
        return h_new, None

    h_last, _ = jax.lax.scan(step, h, jnp.transpose(emb, (1, 0, 2)))
    return h_last @ params["wfc"] + params["bfc"][0]


def init_params(key, vocab, emb_dim, hidden, out_dim):
    ks = jax.random.split(key, 7)
    s = 1.0 / jnp.sqrt(hidden)
    return {
        "embedding": jax.random.normal(ks[0], (vocab, emb_dim), jnp.float32),
        "wih": jax.random.uniform(ks[1], (3, emb_dim, hidden), jnp.float32, -s, s),
        "whh": jax.random.uniform(ks[2], (3, hidden, hidden), jnp.float32, -s, s),
        "bih": jax.random.uniform(ks[3], (3, 1, hidden), jnp.float32, -s, s),
        "bhh": jax.random.uniform(ks[4], (3, 1, hidden), jnp.float32, -s, s),
        "wfc": jax.random.uniform(ks[5], (hidden, out_dim), jnp.float32, -s, s),
        "bfc": jax.random.uniform(ks[6], (1, out_dim), jnp.float32, -s, s),
    }


if __name__ == "__main__":
    # Small shapes implied by the module: batch=2, seq=8, vocab=20, emb=16, hidden=32, out=4
    B, T, V, E, H, O = 2, 8, 20, 16, 32, 4
    key = jax.random.PRNGKey(0)
    k_param, k_x = jax.random.split(key)

    params = init_params(k_param, V, E, H, O)
    x_idx = jax.random.randint(k_x, (B, T), 0, V, dtype=jnp.int32)

    packed = pack_params(params)                       # one-time; cached across calls
    packed = jax.tree_util.tree_map(jax.block_until_ready, packed)

    out = gru_forward(x_idx, packed, out_dim=O)
    out = jax.block_until_ready(out)

    ref = jax.block_until_ready(ref_forward(x_idx, params))
    assert out.shape == (B, O)
    # bf16 MXU path vs f32 reference -> loosened tolerance (per perf review).
    assert jnp.allclose(out, ref, atol=5e-2, rtol=5e-2), (out, ref)

    print("KERNEL_OK")
</pallas_src>

<mosaic_0001>
module attributes {stable_mosaic.version = 11 : i64} {
  func.func @kernel(%arg0: memref<64x384xf32, #tpu.memory_space<vmem>>, %arg1: memref<32x384xbf16, #tpu.memory_space<vmem>>, %arg2: memref<1x128xf32, #tpu.memory_space<vmem>>, %arg3: memref<32x128xbf16, #tpu.memory_space<vmem>>, %arg4: memref<1x128xf32, #tpu.memory_space<vmem>>, %arg5: memref<8x128xf32, #tpu.memory_space<vmem>>) attributes {dimension_semantics = [], scalar_prefetch = 0 : i64, scratch_operands = 0 : i64, tpu.core_type = #tpu.core_type<tc>} {
    %c0 = arith.constant 0 : index
    %c0_0 = arith.constant 0 : index
    %0 = vector.load %arg1[%c0, %c0_0] : memref<32x384xbf16, #tpu.memory_space<vmem>>, vector<32x384xbf16>
    %c0_1 = arith.constant 0 : index
    %c0_2 = arith.constant 0 : index
    %1 = vector.load %arg2[%c0_1, %c0_2] : memref<1x128xf32, #tpu.memory_space<vmem>>, vector<1x128xf32>
    %2 = vector.shape_cast %1 : vector<1x128xf32> to vector<1x128xf32>
    %3 = vector.broadcast %2 : vector<1x128xf32> to vector<8x128xf32>
    %cst = arith.constant 0.000000e+00 : f32
    %4 = vector.broadcast %cst : f32 to vector<8x128xf32>
    %c0_3 = arith.constant 0 : index
    %c0_4 = arith.constant 0 : index
    %5 = vector.load %arg0[%c0_3, %c0_4] : memref<64x384xf32, #tpu.memory_space<vmem>>, vector<8x384xf32>
    %6 = vector.extract_strided_slice %4 {offsets = [0, 0], sizes = [8, 32], strides = [1, 1]} : vector<8x128xf32> to vector<8x32xf32>
    %7 = arith.truncf %6 : vector<8x32xf32> to vector<8x32xbf16>
    %cst_5 = arith.constant dense<0.000000e+00> : vector<8x384xf32>
    %8 = tpu.matmul %7, %0, %cst_5 {dimension_numbers = #tpu.dot_dimension_numbers<[1], [0], [0], [1], [0, 0, 1, 1], [], []>} : vector<8x32xbf16>, vector<32x384xbf16>, vector<8x384xf32> -> vector<8x384xf32>
    %9 = vector.extract_strided_slice %5 {offsets = [0, 0], sizes = [8, 128], strides = [1, 1]} : vector<8x384xf32> to vector<8x128xf32>
    %10 = vector.extract_strided_slice %8 {offsets = [0, 0], sizes = [8, 128], strides = [1, 1]} : vector<8x384xf32> to vector<8x128xf32>
    %11 = arith.addf %9, %10 : vector<8x128xf32>
    %12 = arith.negf %11 : vector<8x128xf32>
    %13 = math.exp %12 : vector<8x128xf32>
    %cst_6 = arith.constant 1.000000e+00 : f32
    %14 = vector.broadcast %cst_6 : f32 to vector<8x128xf32>
    %15 = arith.addf %14, %13 : vector<8x128xf32>
    %16 = arith.divf %14, %15 : vector<8x128xf32>
    %17 = vector.extract_strided_slice %5 {offsets = [0, 128], sizes = [8, 128], strides = [1, 1]} : vector<8x384xf32> to vector<8x128xf32>
    %18 = vector.extract_strided_slice %8 {offsets = [0, 128], sizes = [8, 128], strides = [1, 1]} : vector<8x384xf32> to vector<8x128xf32>
    %19 = arith.addf %17, %18 : vector<8x128xf32>
    %20 = arith.negf %19 : vector<8x128xf32>
    %21 = math.exp %20 : vector<8x128xf32>
    %cst_7 = arith.constant 1.000000e+00 : f32
    %22 = vector.broadcast %cst_7 : f32 to vector<8x128xf32>
    %23 = arith.addf %22, %21 : vector<8x128xf32>
    %24 = arith.divf %22, %23 : vector<8x128xf32>
    %25 = vector.extract_strided_slice %5 {offsets = [0, 256], sizes = [8, 128], strides = [1, 1]} : vector<8x384xf32> to vector<8x128xf32>
    %26 = vector.extract_strided_slice %8 {offsets = [0, 256], sizes = [8, 128], strides = [1, 1]} : vector<8x384xf32> to vector<8x128xf32>
    %27 = arith.addf %26, %3 : vector<8x128xf32>
    %28 = arith.mulf %16, %27 : vector<8x128xf32>
    %29 = arith.addf %25, %28 : vector<8x128xf32>
    %30 = math.tanh %29 : vector<8x128xf32>
    %31 = arith.subf %4, %30 : vector<8x128xf32>
    %32 = arith.mulf %24, %31 : vector<8x128xf32>
    %33 = arith.addf %30, %32 : vector<8x128xf32>
    %c8 = arith.constant 8 : index
    %c0_8 = arith.constant 0 : index
    %34 = vector.load %arg0[%c8, %c0_8] : memref<64x384xf32, #tpu.memory_space<vmem>>, vector<8x384xf32>
    %35 = vector.extract_strided_slice %33 {offsets = [0, 0], sizes = [8, 32], strides = [1, 1]} : vector<8x128xf32> to vector<8x32xf32>
    %36 = arith.truncf %35 : vector<8x32xf32> to vector<8x32xbf16>
    %cst_9 = arith.constant dense<0.000000e+00> : vector<8x384xf32>
    %37 = tpu.matmul %36, %0, %cst_9 {dimension_numbers = #tpu.dot_dimension_numbers<[1], [0], [0], [1], [0, 0, 1, 1], [], []>} : vector<8x32xbf16>, vector<32x384xbf16>, vector<8x384xf32> -> vector<8x384xf32>
    %38 = vector.extract_strided_slice %34 {offsets = [0, 0], sizes = [8, 128], strides = [1, 1]} : vector<8x384xf32> to vector<8x128xf32>
    %39 = vector.extract_strided_slice %37 {offsets = [0, 0], sizes = [8, 128], strides = [1, 1]} : vector<8x384xf32> to vector<8x128xf32>
    %40 = arith.addf %38, %39 : vector<8x128xf32>
    %41 = arith.negf %40 : vector<8x128xf32>
    %42 = math.exp %41 : vector<8x128xf32>
    %cst_10 = arith.constant 1.000000e+00 : f32
    %43 = vector.broadcast %cst_10 : f32 to vector<8x128xf32>
    %44 = arith.addf %43, %42 : vector<8x128xf32>
    %45 = arith.divf %43, %44 : vector<8x128xf32>
    %46 = vector.extract_strided_slice %34 {offsets = [0, 128], sizes = [8, 128], strides = [1, 1]} : vector<8x384xf32> to vector<8x128xf32>
    %47 = vector.extract_strided_slice %37 {offsets = [0, 128], sizes = [8, 128], strides = [1, 1]} : vector<8x384xf32> to vector<8x128xf32>
    %48 = arith.addf %46, %47 : vector<8x128xf32>
    %49 = arith.negf %48 : vector<8x128xf32>
    %50 = math.exp %49 : vector<8x128xf32>
    %cst_11 = arith.constant 1.000000e+00 : f32
    %51 = vector.broadcast %cst_11 : f32 to vector<8x128xf32>
    %52 = arith.addf %51, %50 : vector<8x128xf32>
    %53 = arith.divf %51, %52 : vector<8x128xf32>
    %54 = vector.extract_strided_slice %34 {offsets = [0, 256], sizes = [8, 128], strides = [1, 1]} : vector<8x384xf32> to vector<8x128xf32>
    %55 = vector.extract_strided_slice %37 {offsets = [0, 256], sizes = [8, 128], strides = [1, 1]} : vector<8x384xf32> to vector<8x128xf32>
    %56 = arith.addf %55, %3 : vector<8x128xf32>
    %57 = arith.mulf %45, %56 : vector<8x128xf32>
    %58 = arith.addf %54, %57 : vector<8x128xf32>
    %59 = math.tanh %58 : vector<8x128xf32>
    %60 = arith.subf %33, %59 : vector<8x128xf32>
    %61 = arith.mulf %53, %60 : vector<8x128xf32>
    %62 = arith.addf %59, %61 : vector<8x128xf32>
    %c16 = arith.constant 16 : index
    %c0_12 = arith.constant 0 : index
    %63 = vector.load %arg0[%c16, %c0_12] : memref<64x384xf32, #tpu.memory_space<vmem>>, vector<8x384xf32>
    %64 = vector.extract_strided_slice %62 {offsets = [0, 0], sizes = [8, 32], strides = [1, 1]} : vector<8x128xf32> to vector<8x32xf32>
    %65 = arith.truncf %64 : vector<8x32xf32> to vector<8x32xbf16>
    %cst_13 = arith.constant dense<0.000000e+00> : vector<8x384xf32>
    %66 = tpu.matmul %65, %0, %cst_13 {dimension_numbers = #tpu.dot_dimension_numbers<[1], [0], [0], [1], [0, 0, 1, 1], [], []>} : vector<8x32xbf16>, vector<32x384xbf16>, vector<8x384xf32> -> vector<8x384xf32>
    %67 = vector.extract_strided_slice %63 {offsets = [0, 0], sizes = [8, 128], strides = [1, 1]} : vector<8x384xf32> to vector<8x128xf32>
    %68 = vector.extract_strided_slice %66 {offsets = [0, 0], sizes = [8, 128], strides = [1, 1]} : vector<8x384xf32> to vector<8x128xf32>
    %69 = arith.addf %67, %68 : vector<8x128xf32>
    %70 = arith.negf %69 : vector<8x128xf32>
    %71 = math.exp %70 : vector<8x128xf32>
    %cst_14 = arith.constant 1.000000e+00 : f32
    %72 = vector.broadcast %cst_14 : f32 to vector<8x128xf32>
    %73 = arith.addf %72, %71 : vector<8x128xf32>
    %74 = arith.divf %72, %73 : vector<8x128xf32>
    %75 = vector.extract_strided_slice %63 {offsets = [0, 128], sizes = [8, 128], strides = [1, 1]} : vector<8x384xf32> to vector<8x128xf32>
    %76 = vector.extract_strided_slice %66 {offsets = [0, 128], sizes = [8, 128], strides = [1, 1]} : vector<8x384xf32> to vector<8x128xf32>
    %77 = arith.addf %75, %76 : vector<8x128xf32>
    %78 = arith.negf %77 : vector<8x128xf32>
    %79 = math.exp %78 : vector<8x128xf32>
    %cst_15 = arith.constant 1.000000e+00 : f32
    %80 = vector.broadcast %cst_15 : f32 to vector<8x128xf32>
    %81 = arith.addf %80, %79 : vector<8x128xf32>
    %82 = arith.divf %80, %81 : vector<8x128xf32>
    %83 = vector.extract_strided_slice %63 {offsets = [0, 256], sizes = [8, 128], strides = [1, 1]} : vector<8x384xf32> to vector<8x128xf32>
    %84 = vector.extract_strided_slice %66 {offsets = [0, 256], sizes = [8, 128], strides = [1, 1]} : vector<8x384xf32> to vector<8x128xf32>
    %85 = arith.addf %84, %3 : vector<8x128xf32>
    %86 = arith.mulf %74, %85 : vector<8x128xf32>
    %87 = arith.addf %83, %86 : vector<8x128xf32>
    %88 = math.tanh %87 : vector<8x128xf32>
    %89 = arith.subf %62, %88 : vector<8x128xf32>
    %90 = arith.mulf %82, %89 : vector<8x128xf32>
    %91 = arith.addf %88, %90 : vector<8x128xf32>
    %c24 = arith.constant 24 : index
    %c0_16 = arith.constant 0 : index
    %92 = vector.load %arg0[%c24, %c0_16] : memref<64x384xf32, #tpu.memory_space<vmem>>, vector<8x384xf32>
    %93 = vector.extract_strided_slice %91 {offsets = [0, 0], sizes = [8, 32], strides = [1, 1]} : vector<8x128xf32> to vector<8x32xf32>
    %94 = arith.truncf %93 : vector<8x32xf32> to vector<8x32xbf16>
    %cst_17 = arith.constant dense<0.000000e+00> : vector<8x384xf32>
    %95 = tpu.matmul %94, %0, %cst_17 {dimension_numbers = #tpu.dot_dimension_numbers<[1], [0], [0], [1], [0, 0, 1, 1], [], []>} : vector<8x32xbf16>, vector<32x384xbf16>, vector<8x384xf32> -> vector<8x384xf32>
    %96 = vector.extract_strided_slice %92 {offsets = [0, 0], sizes = [8, 128], strides = [1, 1]} : vector<8x384xf32> to vector<8x128xf32>
    %97 = vector.extract_strided_slice %95 {offsets = [0, 0], sizes = [8, 128], strides = [1, 1]} : vector<8x384xf32> to vector<8x128xf32>
    %98 = arith.addf %96, %97 : vector<8x128xf32>
    %99 = arith.negf %98 : vector<8x128xf32>
    %100 = math.exp %99 : vector<8x128xf32>
    %cst_18 = arith.constant 1.000000e+00 : f32
    %101 = vector.broadcast %cst_18 : f32 to vector<8x128xf32>
    %102 = arith.addf %101, %100 : vector<8x128xf32>
    %103 = arith.divf %101, %102 : vector<8x128xf32>
    %104 = vector.extract_strided_slice %92 {offsets = [0, 128], sizes = [8, 128], strides = [1, 1]} : vector<8x384xf32> to vector<8x128xf32>
    %105 = vector.extract_strided_slice %95 {offsets = [0, 128], sizes = [8, 128], strides = [1, 1]} : vector<8x384xf32> to vector<8x128xf32>
    %106 = arith.addf %104, %105 : vector<8x128xf32>
    %107 = arith.negf %106 : vector<8x128xf32>
    %108 = math.exp %107 : vector<8x128xf32>
    %cst_19 = arith.constant 1.000000e+00 : f32
    %109 = vector.broadcast %cst_19 : f32 to vector<8x128xf32>
    %110 = arith.addf %109, %108 : vector<8x128xf32>
    %111 = arith.divf %109, %110 : vector<8x128xf32>
    %112 = vector.extract_strided_slice %92 {offsets = [0, 256], sizes = [8, 128], strides = [1, 1]} : vector<8x384xf32> to vector<8x128xf32>
    %113 = vector.extract_strided_slice %95 {offsets = [0, 256], sizes = [8, 128], strides = [1, 1]} : vector<8x384xf32> to vector<8x128xf32>
    %114 = arith.addf %113, %3 : vector<8x128xf32>
    %115 = arith.mulf %103, %114 : vector<8x128xf32>
    %116 = arith.addf %112, %115 : vector<8x128xf32>
    %117 = math.tanh %116 : vector<8x128xf32>
    %118 = arith.subf %91, %117 : vector<8x128xf32>
    %119 = arith.mulf %111, %118 : vector<8x128xf32>
    %120 = arith.addf %117, %119 : vector<8x128xf32>
    %c32 = arith.constant 32 : index
    %c0_20 = arith.constant 0 : index
    %121 = vector.load %arg0[%c32, %c0_20] : memref<64x384xf32, #tpu.memory_space<vmem>>, vector<8x384xf32>
    %122 = vector.extract_strided_slice %120 {offsets = [0, 0], sizes = [8, 32], strides = [1, 1]} : vector<8x128xf32> to vector<8x32xf32>
    %123 = arith.truncf %122 : vector<8x32xf32> to vector<8x32xbf16>
    %cst_21 = arith.constant dense<0.000000e+00> : vector<8x384xf32>
    %124 = tpu.matmul %123, %0, %cst_21 {dimension_numbers = #tpu.dot_dimension_numbers<[1], [0], [0], [1], [0, 0, 1, 1], [], []>} : vector<8x32xbf16>, vector<32x384xbf16>, vector<8x384xf32> -> vector<8x384xf32>
    %125 = vector.extract_strided_slice %121 {offsets = [0, 0], sizes = [8, 128], strides = [1, 1]} : vector<8x384xf32> to vector<8x128xf32>
    %126 = vector.extract_strided_slice %124 {offsets = [0, 0], sizes = [8, 128], strides = [1, 1]} : vector<8x384xf32> to vector<8x128xf32>
    %127 = arith.addf %125, %126 : vector<8x128xf32>
    %128 = arith.negf %127 : vector<8x128xf32>
    %129 = math.exp %128 : vector<8x128xf32>
    %cst_22 = arith.constant 1.000000e+00 : f32
    %130 = vector.broadcast %cst_22 : f32 to vector<8x128xf32>
    %131 = arith.addf %130, %129 : vector<8x128xf32>
    %132 = arith.divf %130, %131 : vector<8x128xf32>
    %133 = vector.extract_strided_slice %121 {offsets = [0, 128], sizes = [8, 128], strides = [1, 1]} : vector<8x384xf32> to vector<8x128xf32>
    %134 = vector.extract_strided_slice %124 {offsets = [0, 128], sizes = [8, 128], strides = [1, 1]} : vector<8x384xf32> to vector<8x128xf32>
    %135 = arith.addf %133, %134 : vector<8x128xf32>
    %136 = arith.negf %135 : vector<8x128xf32>
    %137 = math.exp %136 : vector<8x128xf32>
    %cst_23 = arith.constant 1.000000e+00 : f32
    %138 = vector.broadcast %cst_23 : f32 to vector<8x128xf32>
    %139 = arith.addf %138, %137 : vector<8x128xf32>
    %140 = arith.divf %138, %139 : vector<8x128xf32>
    %141 = vector.extract_strided_slice %121 {offsets = [0, 256], sizes = [8, 128], strides = [1, 1]} : vector<8x384xf32> to vector<8x128xf32>
    %142 = vector.extract_strided_slice %124 {offsets = [0, 256], sizes = [8, 128], strides = [1, 1]} : vector<8x384xf32> to vector<8x128xf32>
    %143 = arith.addf %142, %3 : vector<8x128xf32>
    %144 = arith.mulf %132, %143 : vector<8x128xf32>
    %145 = arith.addf %141, %144 : vector<8x128xf32>
    %146 = math.tanh %145 : vector<8x128xf32>
    %147 = arith.subf %120, %146 : vector<8x128xf32>
    %148 = arith.mulf %140, %147 : vector<8x128xf32>
    %149 = arith.addf %146, %148 : vector<8x128xf32>
    %c40 = arith.constant 40 : index
    %c0_24 = arith.constant 0 : index
    %150 = vector.load %arg0[%c40, %c0_24] : memref<64x384xf32, #tpu.memory_space<vmem>>, vector<8x384xf32>
    %151 = vector.extract_strided_slice %149 {offsets = [0, 0], sizes = [8, 32], strides = [1, 1]} : vector<8x128xf32> to vector<8x32xf32>
    %152 = arith.truncf %151 : vector<8x32xf32> to vector<8x32xbf16>
    %cst_25 = arith.constant dense<0.000000e+00> : vector<8x384xf32>
    %153 = tpu.matmul %152, %0, %cst_25 {dimension_numbers = #tpu.dot_dimension_numbers<[1], [0], [0], [1], [0, 0, 1, 1], [], []>} : vector<8x32xbf16>, vector<32x384xbf16>, vector<8x384xf32> -> vector<8x384xf32>
    %154 = vector.extract_strided_slice %150 {offsets = [0, 0], sizes = [8, 128], strides = [1, 1]} : vector<8x384xf32> to vector<8x128xf32>
    %155 = vector.extract_strided_slice %153 {offsets = [0, 0], sizes = [8, 128], strides = [1, 1]} : vector<8x384xf32> to vector<8x128xf32>
    %156 = arith.addf %154, %155 : vector<8x128xf32>
    %157 = arith.negf %156 : vector<8x128xf32>
    %158 = math.exp %157 : vector<8x128xf32>
    %cst_26 = arith.constant 1.000000e+00 : f32
    %159 = vector.broadcast %cst_26 : f32 to vector<8x128xf32>
    %160 = arith.addf %159, %158 : vector<8x128xf32>
    %161 = arith.divf %159, %160 : vector<8x128xf32>
    %162 = vector.extract_strided_slice %150 {offsets = [0, 128], sizes = [8, 128], strides = [1, 1]} : vector<8x384xf32> to vector<8x128xf32>
    %163 = vector.extract_strided_slice %153 {offsets = [0, 128], sizes = [8, 128], strides = [1, 1]} : vector<8x384xf32> to vector<8x128xf32>
    %164 = arith.addf %162, %163 : vector<8x128xf32>
    %165 = arith.negf %164 : vector<8x128xf32>
    %166 = math.exp %165 : vector<8x128xf32>
    %cst_27 = arith.constant 1.000000e+00 : f32
    %167 = vector.broadcast %cst_27 : f32 to vector<8x128xf32>
    %168 = arith.addf %167, %166 : vector<8x128xf32>
    %169 = arith.divf %167, %168 : vector<8x128xf32>
    %170 = vector.extract_strided_slice %150 {offsets = [0, 256], sizes = [8, 128], strides = [1, 1]} : vector<8x384xf32> to vector<8x128xf32>
    %171 = vector.extract_strided_slice %153 {offsets = [0, 256], sizes = [8, 128], strides = [1, 1]} : vector<8x384xf32> to vector<8x128xf32>
    %172 = arith.addf %171, %3 : vector<8x128xf32>
    %173 = arith.mulf %161, %172 : vector<8x128xf32>
    %174 = arith.addf %170, %173 : vector<8x128xf32>
    %175 = math.tanh %174 : vector<8x128xf32>
    %176 = arith.subf %149, %175 : vector<8x128xf32>
    %177 = arith.mulf %169, %176 : vector<8x128xf32>
    %178 = arith.addf %175, %177 : vector<8x128xf32>
    %c48 = arith.constant 48 : index
    %c0_28 = arith.constant 0 : index
    %179 = vector.load %arg0[%c48, %c0_28] : memref<64x384xf32, #tpu.memory_space<vmem>>, vector<8x384xf32>
    %180 = vector.extract_strided_slice %178 {offsets = [0, 0], sizes = [8, 32], strides = [1, 1]} : vector<8x128xf32> to vector<8x32xf32>
    %181 = arith.truncf %180 : vector<8x32xf32> to vector<8x32xbf16>
    %cst_29 = arith.constant dense<0.000000e+00> : vector<8x384xf32>
    %182 = tpu.matmul %181, %0, %cst_29 {dimension_numbers = #tpu.dot_dimension_numbers<[1], [0], [0], [1], [0, 0, 1, 1], [], []>} : vector<8x32xbf16>, vector<32x384xbf16>, vector<8x384xf32> -> vector<8x384xf32>
    %183 = vector.extract_strided_slice %179 {offsets = [0, 0], sizes = [8, 128], strides = [1, 1]} : vector<8x384xf32> to vector<8x128xf32>
    %184 = vector.extract_strided_slice %182 {offsets = [0, 0], sizes = [8, 128], strides = [1, 1]} : vector<8x384xf32> to vector<8x128xf32>
    %185 = arith.addf %183, %184 : vector<8x128xf32>
    %186 = arith.negf %185 : vector<8x128xf32>
    %187 = math.exp %186 : vector<8x128xf32>
    %cst_30 = arith.constant 1.000000e+00 : f32
    %188 = vector.broadcast %cst_30 : f32 to vector<8x128xf32>
    %189 = arith.addf %188, %187 : vector<8x128xf32>
    %190 = arith.divf %188, %189 : vector<8x128xf32>
    %191 = vector.extract_strided_slice %179 {offsets = [0, 128], sizes = [8, 128], strides = [1, 1]} : vector<8x384xf32> to vector<8x128xf32>
    %192 = vector.extract_strided_slice %182 {offsets = [0, 128], sizes = [8, 128], strides = [1, 1]} : vector<8x384xf32> to vector<8x128xf32>
    %193 = arith.addf %191, %192 : vector<8x128xf32>
    %194 = arith.negf %193 : vector<8x128xf32>
    %195 = math.exp %194 : vector<8x128xf32>
    %cst_31 = arith.constant 1.000000e+00 : f32
    %196 = vector.broadcast %cst_31 : f32 to vector<8x128xf32>
    %197 = arith.addf %196, %195 : vector<8x128xf32>
    %198 = arith.divf %196, %197 : vector<8x128xf32>
    %199 = vector.extract_strided_slice %179 {offsets = [0, 256], sizes = [8, 128], strides = [1, 1]} : vector<8x384xf32> to vector<8x128xf32>
    %200 = vector.extract_strided_slice %182 {offsets = [0, 256], sizes = [8, 128], strides = [1, 1]} : vector<8x384xf32> to vector<8x128xf32>
    %201 = arith.addf %200, %3 : vector<8x128xf32>
    %202 = arith.mulf %190, %201 : vector<8x128xf32>
    %203 = arith.addf %199, %202 : vector<8x128xf32>
    %204 = math.tanh %203 : vector<8x128xf32>
    %205 = arith.subf %178, %204 : vector<8x128xf32>
    %206 = arith.mulf %198, %205 : vector<8x128xf32>
    %207 = arith.addf %204, %206 : vector<8x128xf32>
    %c56 = arith.constant 56 : index
    %c0_32 = arith.constant 0 : index
    %208 = vector.load %arg0[%c56, %c0_32] : memref<64x384xf32, #tpu.memory_space<vmem>>, vector<8x384xf32>
    %209 = vector.extract_strided_slice %207 {offsets = [0, 0], sizes = [8, 32], strides = [1, 1]} : vector<8x128xf32> to vector<8x32xf32>
    %210 = arith.truncf %209 : vector<8x32xf32> to vector<8x32xbf16>
    %cst_33 = arith.constant dense<0.000000e+00> : vector<8x384xf32>
    %211 = tpu.matmul %210, %0, %cst_33 {dimension_numbers = #tpu.dot_dimension_numbers<[1], [0], [0], [1], [0, 0, 1, 1], [], []>} : vector<8x32xbf16>, vector<32x384xbf16>, vector<8x384xf32> -> vector<8x384xf32>
    %212 = vector.extract_strided_slice %208 {offsets = [0, 0], sizes = [8, 128], strides = [1, 1]} : vector<8x384xf32> to vector<8x128xf32>
    %213 = vector.extract_strided_slice %211 {offsets = [0, 0], sizes = [8, 128], strides = [1, 1]} : vector<8x384xf32> to vector<8x128xf32>
    %214 = arith.addf %212, %213 : vector<8x128xf32>
    %215 = arith.negf %214 : vector<8x128xf32>
    %216 = math.exp %215 : vector<8x128xf32>
    %cst_34 = arith.constant 1.000000e+00 : f32
    %217 = vector.broadcast %cst_34 : f32 to vector<8x128xf32>
    %218 = arith.addf %217, %216 : vector<8x128xf32>
    %219 = arith.divf %217, %218 : vector<8x128xf32>
    %220 = vector.extract_strided_slice %208 {offsets = [0, 128], sizes = [8, 128], strides = [1, 1]} : vector<8x384xf32> to vector<8x128xf32>
    %221 = vector.extract_strided_slice %211 {offsets = [0, 128], sizes = [8, 128], strides = [1, 1]} : vector<8x384xf32> to vector<8x128xf32>
    %222 = arith.addf %220, %221 : vector<8x128xf32>
    %223 = arith.negf %222 : vector<8x128xf32>
    %224 = math.exp %223 : vector<8x128xf32>
    %cst_35 = arith.constant 1.000000e+00 : f32
    %225 = vector.broadcast %cst_35 : f32 to vector<8x128xf32>
    %226 = arith.addf %225, %224 : vector<8x128xf32>
    %227 = arith.divf %225, %226 : vector<8x128xf32>
    %228 = vector.extract_strided_slice %208 {offsets = [0, 256], sizes = [8, 128], strides = [1, 1]} : vector<8x384xf32> to vector<8x128xf32>
    %229 = vector.extract_strided_slice %211 {offsets = [0, 256], sizes = [8, 128], strides = [1, 1]} : vector<8x384xf32> to vector<8x128xf32>
    %230 = arith.addf %229, %3 : vector<8x128xf32>
    %231 = arith.mulf %219, %230 : vector<8x128xf32>
    %232 = arith.addf %228, %231 : vector<8x128xf32>
    %233 = math.tanh %232 : vector<8x128xf32>
    %234 = arith.subf %207, %233 : vector<8x128xf32>
    %235 = arith.mulf %227, %234 : vector<8x128xf32>
    %236 = arith.addf %233, %235 : vector<8x128xf32>
    %237 = vector.extract_strided_slice %236 {offsets = [0, 0], sizes = [8, 32], strides = [1, 1]} : vector<8x128xf32> to vector<8x32xf32>
    %238 = arith.truncf %237 : vector<8x32xf32> to vector<8x32xbf16>
    %c0_36 = arith.constant 0 : index
    %c0_37 = arith.constant 0 : index
    %239 = vector.load %arg3[%c0_36, %c0_37] : memref<32x128xbf16, #tpu.memory_space<vmem>>, vector<32x128xbf16>
    %cst_38 = arith.constant dense<0.000000e+00> : vector<8x128xf32>
    %240 = tpu.matmul %238, %239, %cst_38 {dimension_numbers = #tpu.dot_dimension_numbers<[1], [0], [0], [1], [0, 0, 1, 1], [], []>} : vector<8x32xbf16>, vector<32x128xbf16>, vector<8x128xf32> -> vector<8x128xf32>
    %c0_39 = arith.constant 0 : index
    %c0_40 = arith.constant 0 : index
    %241 = vector.load %arg4[%c0_39, %c0_40] : memref<1x128xf32, #tpu.memory_space<vmem>>, vector<1x128xf32>
    %242 = vector.broadcast %241 : vector<1x128xf32> to vector<8x128xf32>
    %243 = arith.addf %240, %242 : vector<8x128xf32>
    %c0_41 = arith.constant 0 : index
    %c0_42 = arith.constant 0 : index
    %244 = vector.load %arg5[%c0_41, %c0_42] : memref<8x128xf32, #tpu.memory_space<vmem>>, vector<8x128xf32>
    tpu.vector_store %arg5[%c0_41, %c0_42], %243 {strides = array<i32>} : memref<8x128xf32, #tpu.memory_space<vmem>>, vector<8x128xf32>,
    return
  }
}

</mosaic_0001>

<bundles_post_ra>
// kernel: gru_forward.1
= control target key start
LH: loop header
LB: loop body
LE: loop exit
PB: predicated region body
PF: predicated region fallthrough
CT: control target
= control target key end

     0   :  { %v1012_v18 = vmov 0   ;;  %vm68_vm8 = vcmask 261120   ;;  %s1288_s1 = inlined_call_operand.vmem [shape: bf16[32,384], index: 1, kind: input, shape index: {}]   ;;  %s1289_s2 = inlined_call_operand.vmem [shape: f32[1,128], index: 2, kind: input, shape index: {}]   ;;  %s1290_s0 = inlined_call_operand.vmem [shape: f32[64,384], index: 0, kind: input, shape index: {}]   ;;  %s1291_s4 = inlined_call_operand.vmem [shape: f32[1,128], index: 4, kind: input, shape index: {}]   ;;  %s1292_s3 = inlined_call_operand.vmem [shape: bf16[32,128], index: 3, kind: input, shape index: {}]   ;;  %s1293_s5 = inlined_call_operand.vmem [shape: f32[8,128], index: 5, kind: output, shape index: {}]  }
   0x1   :  { %v865_v0 = vld [vmem:[%s1288_s1 + $0x18] sm:$0xf]  ;;  %v925_v1 = vld [vmem:[%s1288_s1 + $0x20] sm:$0xf0]  ;;  %v924_v2 = vld [vmem:[%s1288_s1 + $0x1c] sm:$0xf] }
   0x2   :  { %v1052_v3 = vor.u32 %v925_v1, %v865_v0  ;;  %v867_v4 = vld [vmem:[%s1288_s1 + $0x24] sm:$0xf0]  ;;  %v853_v5 = vld [vmem:[%s1288_s1] sm:$0xf]  ;;  %v922_v6 = vld [vmem:[%s1288_s1 + $0x8] sm:$0xf0] }
   0x3   :  { %v1063_v7 = vor.u32 %v924_v2, %v867_v4  ;;  %v921_v8 = vld [vmem:[%s1288_s1 + $0x4] sm:$0xf]  ;;  %v855_v9 = vld [vmem:[%s1288_s1 + $0xc] sm:$0xf0]  ;;  %v873_v10 = vld [vmem:[%s1288_s1 + $0x20] sm:$0xf]  ;;  %v1075_v11 = vor.u32 %v922_v6, %v853_v5 }
   0x4   :  { %78 = vmatpush.bf16.msra.mxu0 %v1052_v3  ;;  %v926_v12 = vld [vmem:[%s1288_s1 + $0x28] sm:$0xf0]  ;;  %v861_v13 = vld [vmem:[%s1288_s1 + $0x8] sm:$0xf]  ;;  %v923_v14 = vld [vmem:[%s1288_s1 + $0x10] sm:$0xf0]  ;;  %171 = vmatpush.bf16.msra.mxu3 %v1052_v3  ;;  %v1088_v15 = vor.u32 %v921_v8, %v855_v9 }
   0x5   :  { %91 = vmatpush.bf16.msra.mxu1 %v1063_v7  ;;  %v1090_v16 = vor.u32 %v926_v12, %v873_v10  ;;  %v1093_v17 = vor.u32 %v923_v14, %v861_v13  ;;  %v33_v19 = vld [vmem:[%s1290_s0] sm:$0xff]  ;;  %v34_v20 = vld [vmem:[%s1290_s0 + $0x8] sm:$0xff]  ;;  %v35_v49 = vld [vmem:[%s1290_s0 + $0x10] sm:$0xff] }
   0x6   :  { %v1122_v38 = vld [vmem:[%s1289_s2] ss:$0 sm:$0xff]  ;;  %v158_v8 = vld [vmem:[%s1290_s0 + $0x18] sm:$0xff] }
   0x7   :  { %104 = vmatpush.bf16.msra.mxu2 %v1090_v16  ;;  %v159_v1 = vld [vmem:[%s1290_s0 + $0x20] sm:$0xff] }
   0x8   :  { %79 = vmatpush.bf16.msra.mxu0 %v1075_v11  ;;  %172 = vmatpush.bf16.msra.mxu3 %v1075_v11 }
   0x9   :  { %92 = vmatpush.bf16.msra.mxu1 %v1088_v15 }
   0xb   :  { %80 = vmatmul.bf16.vlgmr.msra.gmra.mxu0 %v1012_v18  ;;  %105 = vmatpush.bf16.msra.mxu2 %v1093_v17 }
   0xc   :  { %184 = vmatpush.bf16.msrb.mxu0 %v1063_v7  ;;  %277 = vmatpush.bf16.msrb.mxu3 %v1063_v7 }
   0xd   :  { %197 = vmatpush.bf16.msrb.mxu1 %v1090_v16 }
   0xe   :  { %93 = vmatmul.bf16.vlgmr.msra.gmra.mxu1 %v1012_v18  ;;  %106 = vmatmul.bf16.vlgmr.msra.gmra.mxu2 %v1012_v18 }
   0xf   :  { %264 = vmatpush.bf16.msrb.mxu2 %v1052_v3 }
  0x10   :  { %185 = vmatpush.bf16.msrb.mxu0 %v1088_v15  ;;  %278 = vmatpush.bf16.msrb.mxu3 %v1088_v15 }
  0x11   :  { %198 = vmatpush.bf16.msrb.mxu1 %v1093_v17 }
  0x13   :  { %265 = vmatpush.bf16.msrb.mxu2 %v1075_v11 }
  0x14   :  { %290 = vmatpush.bf16.msra.mxu0 %v1090_v16 }
  0x15   :  { %357 = vmatpush.bf16.msra.mxu1 %v1052_v3 }
  0x17   :  { %370 = vmatpush.bf16.msra.mxu2 %v1063_v7 }
  0x18   :  { %291 = vmatpush.bf16.msra.mxu0 %v1093_v17 }
  0x19   :  { %358 = vmatpush.bf16.msra.mxu1 %v1075_v11 }
  0x1b   :  { %371 = vmatpush.bf16.msra.mxu2 %v1088_v15 }
  0x88   :  { %v81_v21 = vpop.f32.mrf.mxu0 }
  0x89   :  { %v111_v22 = vadd.f32 %v81_v21, %v33_v19 }
  0x8b   :  { %v94_v23 = vpop.f32.mrf.mxu1  ;;  %v875_v25 = vmul.f32 -1.442695, %v111_v22 }
  0x8c   :  { %v131_v24 = vadd.f32 %v94_v23, %v34_v20 }
  0x8d   :  { %932 = vpow2.f32 %v875_v25 }
  0x8e   :  { %v876_v26 = vmul.f32 -1.442695, %v131_v24 }
  0x90   :  { %934 = vpow2.f32 %v876_v26  ;;  %v83_v27 = vpop.f32.mrf.mxu0 }
  0x91   :  { %v107_v29 = vpop.f32.mrf.mxu2 }
  0x92   :  { %v151_v45 = vadd.f32 %v1122_v38, %v107_v29 }
  0x93   :  { %v96_v28 = vpop.f32.mrf.mxu1  ;;  %v933_v30 = vpop.eup %932 }
  0x94   :  { %v115_v32 = vadd.f32 1.0, %v933_v30 }
  0x96   :  { %v935_v31 = vpop.eup %934  ;;  %936 = vrcp.f32 %v115_v32  ;;  %v127_v41 = vand.u32 2147483648, %v115_v32  ;;  %v125_v43 = vand.u32 2147483647, %v115_v32  ;;  %vm121_vm1 = vweird.f32 %v115_v32 }
  0x97   :  { %v135_v33 = vadd.f32 1.0, %v935_v31 }
  0x98   :  { %v128_v47 = vor.u32 1.1754944e-38, %v127_v41  ;;  %vm126_vm3 = vcmp.eq.f32.partialorder %v125_v43, 8.507059e+37 }
  0x99   :  { %938 = vrcp.f32 %v135_v33  ;;  %v109_v34 = vpop.f32.mrf.mxu2  ;;  %vm141_vm4 = vweird.f32 %v135_v33  ;;  %v147_v54 = vand.u32 2147483648, %v135_v33  ;;  %v145_v56 = vand.u32 2147483647, %v135_v33 }
  0x9b   :  { %v148_v57 = vor.u32 1.1754944e-38, %v147_v54  ;;  %vm146_vm7 = vcmp.eq.f32.partialorder %v145_v56, 8.507059e+37  ;;  %v251_v54 = vld [vmem:[%s1290_s0 + $0x30] sm:$0xff] }
  0x9c   :  { %v937_v35 = vpop.eup %936 }
  0x9d   :  { %v117_v37 = vmul.f32 %v937_v35, %v115_v32  ;;  %vm122_vm0 = vweird.f32 %v937_v35 }
  0x9e   :  { %vm123_vm2 = vmor %vm121_vm1, %vm122_vm0 }
  0x9f   :  { %v939_v36 = vpop.eup %938  ;;  %v118_v39 = vsub.f32 1.0, %v117_v37  ;;  %v160_v37 = vld [vmem:[%s1290_s0 + $0x28] sm:$0xff] }
  0xa0   :  { %v137_v40 = vmul.f32 %v939_v36, %v135_v33  ;;  %vm142_vm5 = vweird.f32 %v939_v36 }
  0xa1   :  { %v119_v42 = vmul.f32 %v937_v35, %v118_v39  ;;  %vm143_vm6 = vmor %vm141_vm4, %vm142_vm5 }
  0xa2   :  { %v138_v46 = vsub.f32 1.0, %v137_v40 }
  0xa3   :  { %v120_v44 = vadd.f32 %v937_v35, %v119_v42 }
  0xa4   :  { %v139_v52 = vmul.f32 %v939_v36, %v138_v46 }
  0xa5   :  { %v124_v48 = vsel %vm123_vm2, %v937_v35, %v120_v44 }
  0xa6   :  { %v129_v50 = vsel %vm126_vm3, %v128_v47, %v124_v48  ;;  %v140_v55 = vadd.f32 %v939_v36, %v139_v52 }
  0xa7   :  { %v152_v51 = vmul.f32 %v151_v45, %v129_v50 }
  0xa8   :  { %v144_v58 = vsel %vm143_vm6, %v939_v36, %v140_v55  ;;  %v252_v55 = vld [vmem:[%s1290_s0 + $0x38] sm:$0xff] }
  0xa9   :  { %v153_v53 = vadd.f32 %v152_v51, %v35_v49  ;;  %v149_v61 = vsel %vm146_vm7, %v148_v57, %v144_v58 }
  0xab   :  { %940 = vtanh.f32 %v153_v53 }
  0xb1   :  { %v941_v59 = vpop.eup %940 }
  0xb2   :  { %v155_v60 = vsub.f32 0.0, %v941_v59 }
  0xb4   :  { %v156_v62 = vmul.f32 %v155_v60, %v149_v61 }
  0xb6   :  { %v1128_v63 = vadd.f32 %v941_v59, %v156_v62 }
  0xb8   :  { %v161_v0 = vpack.c.bf16 %v1128_v63, %v1128_v63 }
  0xba   :  { %877 = vmatmul.msk.bf16.vlgmr.msra.gmra.mxu3 %vm68_vm8, %v161_v0  ;;  %878 = vmatmul.msk.bf16.vlgmr.msrb.gmra.mxu0 %vm68_vm8, %v161_v0 }
  0xbb   :  { %879 = vmatmul.msk.bf16.vlgmr.msrb.gmra.mxu1 %vm68_vm8, %v161_v0  ;;  %383 = vmatpush.bf16.msra.mxu3 %v1090_v16 }
  0xbc   :  { %450 = vmatpush.bf16.msrb.mxu0 %v1052_v3  ;;  %463 = vmatpush.bf16.msrb.mxu1 %v1063_v7 }
  0xbf   :  { %384 = vmatpush.bf16.msra.mxu3 %v1093_v17 }
  0xc0   :  { %451 = vmatpush.bf16.msrb.mxu0 %v1075_v11  ;;  %464 = vmatpush.bf16.msrb.mxu1 %v1088_v15 }
 0x137   :  { %v187_v2 = vpop.f32.mrf.mxu0 }
 0x138   :  { %v224_v4 = vadd.f32 %v187_v2, %v159_v1  ;;  %v200_v5 = vpop.f32.mrf.mxu1 }
 0x139   :  { %v244_v34 = vadd.f32 %v1122_v38, %v200_v5 }
 0x13a   :  { %v881_v6 = vmul.f32 -1.442695, %v224_v4 }
 0x13c   :  { %942 = vpow2.f32 %v881_v6 }
 0x13d   :  { %v174_v9 = vpop.f32.mrf.mxu3 }
 0x13e   :  { %v204_v10 = vadd.f32 %v174_v9, %v158_v8 }
 0x13f   :  { %v189_v12 = vpop.f32.mrf.mxu0 }
 0x140   :  { %v880_v13 = vmul.f32 -1.442695, %v204_v10  ;;  %v202_v14 = vpop.f32.mrf.mxu1 }
 0x142   :  { %944 = vpow2.f32 %v880_v13  ;;  %v943_v18 = vpop.eup %942 }
 0x143   :  { %v228_v21 = vadd.f32 1.0, %v943_v18 }
 0x145   :  { %v176_v19 = vpop.f32.mrf.mxu3  ;;  %v240_v43 = vand.u32 2147483648, %v228_v21  ;;  %vm234_vm14 = vweird.f32 %v228_v21  ;;  %v238_v44 = vand.u32 2147483647, %v228_v21 }
 0x147   :  { %v241_v47 = vor.u32 1.1754944e-38, %v240_v43  ;;  %vm239_vm0 = vcmp.eq.f32.partialorder %v238_v44, 8.507059e+37 }
 0x148   :  { %v945_v20 = vpop.eup %944 }
 0x149   :  { %v208_v22 = vadd.f32 1.0, %v945_v20 }
 0x14b   :  { %946 = vrcp.f32 %v208_v22  ;;  %v220_v28 = vand.u32 2147483648, %v208_v22  ;;  %v218_v30 = vand.u32 2147483647, %v208_v22  ;;  %vm214_vm10 = vweird.f32 %v208_v22 }
 0x14c   :  { %948 = vrcp.f32 %v228_v21 }
 0x14d   :  { %v221_v33 = vor.u32 1.1754944e-38, %v220_v28  ;;  %vm219_vm12 = vcmp.eq.f32.partialorder %v218_v30, 8.507059e+37 }
 0x151   :  { %v947_v23 = vpop.eup %946 }
 0x152   :  { %v949_v24 = vpop.eup %948  ;;  %v210_v25 = vmul.f32 %v947_v23, %v208_v22  ;;  %vm215_vm9 = vweird.f32 %v947_v23 }
 0x153   :  { %v230_v27 = vmul.f32 %v949_v24, %v228_v21  ;;  %vm216_vm11 = vmor %vm214_vm10, %vm215_vm9  ;;  %vm235_vm13 = vweird.f32 %v949_v24 }
 0x154   :  { %v211_v26 = vsub.f32 1.0, %v210_v25  ;;  %vm236_vm15 = vmor %vm234_vm14, %vm235_vm13  ;;  %v253_v25 = vld [vmem:[%s1290_s0 + $0x40] sm:$0xff] }
 0x155   :  { %v231_v32 = vsub.f32 1.0, %v230_v27 }
 0x156   :  { %v212_v29 = vmul.f32 %v947_v23, %v211_v26 }
 0x157   :  { %v232_v40 = vmul.f32 %v949_v24, %v231_v32 }
 0x158   :  { %v213_v31 = vadd.f32 %v947_v23, %v212_v29 }
 0x159   :  { %v233_v42 = vadd.f32 %v949_v24, %v232_v40 }
 0x15a   :  { %v217_v35 = vsel %vm216_vm11, %v947_v23, %v213_v31 }
 0x15b   :  { %v222_v36 = vsel %vm219_vm12, %v221_v33, %v217_v35  ;;  %v237_v45 = vsel %vm236_vm15, %v949_v24, %v233_v42 }
 0x15c   :  { %v245_v39 = vmul.f32 %v244_v34, %v222_v36  ;;  %v242_v49 = vsel %vm239_vm0, %v241_v47, %v237_v45  ;;  %v345_v45 = vld [vmem:[%s1290_s0 + $0x50] sm:$0xff] }
 0x15e   :  { %v246_v41 = vadd.f32 %v245_v39, %v160_v37 }
 0x160   :  { %950 = vtanh.f32 %v246_v41  ;;  %v344_v41 = vld [vmem:[%s1290_s0 + $0x48] sm:$0xff] }
 0x166   :  { %v951_v46 = vpop.eup %950 }
 0x167   :  { %v248_v48 = vsub.f32 %v1128_v63, %v951_v46 }
 0x169   :  { %v249_v50 = vmul.f32 %v248_v48, %v242_v49 }
 0x16b   :  { %v1152_v51 = vadd.f32 %v951_v46, %v249_v50 }
 0x16d   :  { %v254_v52 = vpack.c.bf16 %v1152_v51, %v1152_v51 }
 0x16f   :  { %882 = vmatmul.msk.bf16.vlgmr.msrb.gmra.mxu2 %vm68_vm8, %v254_v52  ;;  %883 = vmatmul.msk.bf16.vlgmr.msrb.gmra.mxu3 %vm68_vm8, %v254_v52 }
 0x170   :  { %884 = vmatmul.msk.bf16.vlgmr.msra.gmra.mxu0 %vm68_vm8, %v254_v52  ;;  %476 = vmatpush.bf16.msrb.mxu2 %v1090_v16 }
 0x171   :  { %543 = vmatpush.bf16.msrb.mxu3 %v1052_v3  ;;  %556 = vmatpush.bf16.msra.mxu0 %v1063_v7 }
 0x174   :  { %477 = vmatpush.bf16.msrb.mxu2 %v1093_v17 }
 0x175   :  { %544 = vmatpush.bf16.msrb.mxu3 %v1075_v11  ;;  %557 = vmatpush.bf16.msra.mxu0 %v1088_v15 }
 0x1ed   :  { %v293_v53 = vpop.f32.mrf.mxu0 }
 0x1ee   :  { %v337_v22 = vadd.f32 %v1122_v38, %v293_v53 }
 0x1f2   :  { %v267_v56 = vpop.f32.mrf.mxu2  ;;  %v280_v57 = vpop.f32.mrf.mxu3 }
 0x1f3   :  { %v297_v58 = vadd.f32 %v267_v56, %v251_v54  ;;  %v317_v59 = vadd.f32 %v280_v57, %v252_v55 }
 0x1f5   :  { %v885_v60 = vmul.f32 -1.442695, %v297_v58  ;;  %v886_v61 = vmul.f32 -1.442695, %v317_v59  ;;  %v295_v62 = vpop.f32.mrf.mxu0 }
 0x1f7   :  { %952 = vpow2.f32 %v885_v60 }
 0x1f8   :  { %954 = vpow2.f32 %v886_v61 }
 0x1fa   :  { %v269_v63 = vpop.f32.mrf.mxu2  ;;  %v282_v0 = vpop.f32.mrf.mxu3 }
 0x1fd   :  { %v953_v1 = vpop.eup %952 }
 0x1fe   :  { %v955_v2 = vpop.eup %954  ;;  %v301_v4 = vadd.f32 1.0, %v953_v1 }
 0x1ff   :  { %v321_v5 = vadd.f32 1.0, %v955_v2 }
 0x200   :  { %956 = vrcp.f32 %v301_v4  ;;  %v313_v12 = vand.u32 2147483648, %v301_v4  ;;  %v311_v18 = vand.u32 2147483647, %v301_v4  ;;  %vm307_vm2 = vweird.f32 %v301_v4 }
 0x201   :  { %958 = vrcp.f32 %v321_v5  ;;  %v333_v30 = vand.u32 2147483648, %v321_v5  ;;  %vm327_vm6 = vweird.f32 %v321_v5  ;;  %v331_v31 = vand.u32 2147483647, %v321_v5 }
 0x202   :  { %v314_v20 = vor.u32 1.1754944e-38, %v313_v12  ;;  %vm312_vm4 = vcmp.eq.f32.partialorder %v311_v18, 8.507059e+37 }
 0x203   :  { %v334_v34 = vor.u32 1.1754944e-38, %v333_v30  ;;  %vm332_vm9 = vcmp.eq.f32.partialorder %v331_v31, 8.507059e+37 }
 0x206   :  { %v957_v6 = vpop.eup %956 }
 0x207   :  { %v959_v8 = vpop.eup %958  ;;  %v303_v9 = vmul.f32 %v957_v6, %v301_v4  ;;  %vm308_vm1 = vweird.f32 %v957_v6 }
 0x208   :  { %v323_v13 = vmul.f32 %v959_v8, %v321_v5  ;;  %vm309_vm3 = vmor %vm307_vm2, %vm308_vm1  ;;  %vm328_vm5 = vweird.f32 %v959_v8 }
 0x209   :  { %v304_v10 = vsub.f32 1.0, %v303_v9  ;;  %vm329_vm7 = vmor %vm327_vm6, %vm328_vm5 }
 0x20a   :  { %v324_v21 = vsub.f32 1.0, %v323_v13 }
 0x20b   :  { %v305_v14 = vmul.f32 %v957_v6, %v304_v10 }
 0x20c   :  { %v325_v27 = vmul.f32 %v959_v8, %v324_v21 }
 0x20d   :  { %v306_v19 = vadd.f32 %v957_v6, %v305_v14 }
 0x20e   :  { %v326_v29 = vadd.f32 %v959_v8, %v325_v27 }
 0x20f   :  { %v310_v23 = vsel %vm309_vm3, %v957_v6, %v306_v19 }
 0x210   :  { %v315_v24 = vsel %vm312_vm4, %v314_v20, %v310_v23  ;;  %v330_v32 = vsel %vm329_vm7, %v959_v8, %v326_v29  ;;  %v346_v8 = vld [vmem:[%s1290_s0 + $0x58] sm:$0xff]  ;;  %v438_v29 = vld [vmem:[%s1290_s0 + $0x68] sm:$0xff] }
 0x211   :  { %v338_v26 = vmul.f32 %v337_v22, %v315_v24  ;;  %v335_v36 = vsel %vm332_vm9, %v334_v34, %v330_v32 }
 0x213   :  { %v339_v28 = vadd.f32 %v338_v26, %v253_v25 }
 0x215   :  { %960 = vtanh.f32 %v339_v28  ;;  %v437_v28 = vld [vmem:[%s1290_s0 + $0x60] sm:$0xff] }
 0x21b   :  { %v961_v33 = vpop.eup %960 }
 0x21c   :  { %v341_v35 = vsub.f32 %v1152_v51, %v961_v33 }
 0x21e   :  { %v342_v37 = vmul.f32 %v341_v35, %v335_v36 }
 0x220   :  { %v1176_v39 = vadd.f32 %v961_v33, %v342_v37 }
 0x222   :  { %v347_v40 = vpack.c.bf16 %v1176_v39, %v1176_v39 }
 0x224   :  { %887 = vmatmul.msk.bf16.vlgmr.msra.gmra.mxu1 %vm68_vm8, %v347_v40  ;;  %888 = vmatmul.msk.bf16.vlgmr.msra.gmra.mxu2 %vm68_vm8, %v347_v40 }
 0x225   :  { %889 = vmatmul.msk.bf16.vlgmr.msra.gmra.mxu3 %vm68_vm8, %v347_v40  ;;  %569 = vmatpush.bf16.msra.mxu1 %v1090_v16 }
 0x226   :  { %636 = vmatpush.bf16.msra.mxu2 %v1052_v3  ;;  %649 = vmatpush.bf16.msra.mxu3 %v1063_v7 }
 0x229   :  { %570 = vmatpush.bf16.msra.mxu1 %v1093_v17 }
 0x22a   :  { %637 = vmatpush.bf16.msra.mxu2 %v1075_v11  ;;  %650 = vmatpush.bf16.msra.mxu3 %v1088_v15 }
 0x2a1   :  { %v360_v42 = vpop.f32.mrf.mxu1 }
 0x2a2   :  { %v390_v43 = vadd.f32 %v360_v42, %v344_v41 }
 0x2a4   :  { %v890_v44 = vmul.f32 -1.442695, %v390_v43 }
 0x2a6   :  { %962 = vpow2.f32 %v890_v44 }
 0x2a7   :  { %v373_v46 = vpop.f32.mrf.mxu2 }
 0x2a8   :  { %v410_v47 = vadd.f32 %v373_v46, %v345_v45  ;;  %v386_v48 = vpop.f32.mrf.mxu3 }
 0x2a9   :  { %v362_v49 = vpop.f32.mrf.mxu1  ;;  %v430_v6 = vadd.f32 %v1122_v38, %v386_v48 }
 0x2aa   :  { %v891_v50 = vmul.f32 -1.442695, %v410_v47 }
 0x2ac   :  { %v963_v51 = vpop.eup %962  ;;  %964 = vpow2.f32 %v891_v50 }
 0x2ad   :  { %v394_v52 = vadd.f32 1.0, %v963_v51 }
 0x2af   :  { %966 = vrcp.f32 %v394_v52  ;;  %v375_v53 = vpop.f32.mrf.mxu2  ;;  %v406_v60 = vand.u32 2147483648, %v394_v52  ;;  %v404_v62 = vand.u32 2147483647, %v394_v52  ;;  %vm400_vm11 = vweird.f32 %v394_v52 }
 0x2b0   :  { %v388_v54 = vpop.f32.mrf.mxu3 }
 0x2b1   :  { %v407_v2 = vor.u32 1.1754944e-38, %v406_v60  ;;  %vm405_vm13 = vcmp.eq.f32.partialorder %v404_v62, 8.507059e+37  ;;  %v439_v54 = vld [vmem:[%s1290_s0 + $0x70] sm:$0xff] }
 0x2b2   :  { %v965_v55 = vpop.eup %964 }
 0x2b3   :  { %v414_v56 = vadd.f32 1.0, %v965_v55 }
 0x2b5   :  { %v967_v57 = vpop.eup %966  ;;  %968 = vrcp.f32 %v414_v56  ;;  %v426_v18 = vand.u32 2147483648, %v414_v56  ;;  %vm420_vm15 = vweird.f32 %v414_v56  ;;  %v424_v19 = vand.u32 2147483647, %v414_v56 }
 0x2b6   :  { %v396_v58 = vmul.f32 %v967_v57, %v394_v52  ;;  %vm401_vm10 = vweird.f32 %v967_v57 }
 0x2b7   :  { %vm402_vm12 = vmor %vm400_vm11, %vm401_vm10  ;;  %v427_v22 = vor.u32 1.1754944e-38, %v426_v18  ;;  %vm425_vm1 = vcmp.eq.f32.partialorder %v424_v19, 8.507059e+37 }
 0x2b8   :  { %v397_v59 = vsub.f32 1.0, %v396_v58 }
 0x2ba   :  { %v398_v61 = vmul.f32 %v967_v57, %v397_v59 }
 0x2bb   :  { %v969_v63 = vpop.eup %968 }
 0x2bc   :  { %v416_v0 = vmul.f32 %v969_v63, %v414_v56  ;;  %v399_v1 = vadd.f32 %v967_v57, %v398_v61  ;;  %vm421_vm14 = vweird.f32 %v969_v63 }
 0x2bd   :  { %vm422_vm0 = vmor %vm420_vm15, %vm421_vm14 }
 0x2be   :  { %v417_v4 = vsub.f32 1.0, %v416_v0  ;;  %v403_v5 = vsel %vm402_vm12, %v967_v57, %v399_v1 }
 0x2bf   :  { %v408_v9 = vsel %vm405_vm13, %v407_v2, %v403_v5 }
 0x2c0   :  { %v431_v10 = vmul.f32 %v430_v6, %v408_v9  ;;  %v418_v12 = vmul.f32 %v969_v63, %v417_v4 }
 0x2c2   :  { %v432_v13 = vadd.f32 %v431_v10, %v346_v8  ;;  %v419_v14 = vadd.f32 %v969_v63, %v418_v12  ;;  %v531_v8 = vld [vmem:[%s1290_s0 + $0x80] sm:$0xff] }
 0x2c4   :  { %970 = vtanh.f32 %v432_v13  ;;  %v423_v20 = vsel %vm422_vm0, %v969_v63, %v419_v14  ;;  %v530_v14 = vld [vmem:[%s1290_s0 + $0x78] sm:$0xff] }
 0x2c5   :  { %v428_v24 = vsel %vm425_vm1, %v427_v22, %v423_v20 }
 0x2ca   :  { %v971_v21 = vpop.eup %970 }
 0x2cb   :  { %v434_v23 = vsub.f32 %v1176_v39, %v971_v21 }
 0x2cd   :  { %v435_v25 = vmul.f32 %v434_v23, %v428_v24 }
 0x2cf   :  { %v1200_v26 = vadd.f32 %v971_v21, %v435_v25 }
 0x2d1   :  { %v440_v27 = vpack.c.bf16 %v1200_v26, %v1200_v26 }
 0x2d3   :  { %892 = vmatmul.msk.bf16.vlgmr.msrb.gmra.mxu0 %vm68_vm8, %v440_v27  ;;  %893 = vmatmul.msk.bf16.vlgmr.msrb.gmra.mxu1 %vm68_vm8, %v440_v27 }
 0x2d4   :  { %894 = vmatmul.msk.bf16.vlgmr.msrb.gmra.mxu2 %vm68_vm8, %v440_v27  ;;  %662 = vmatpush.bf16.msrb.mxu0 %v1090_v16 }
 0x2d5   :  { %729 = vmatpush.bf16.msrb.mxu1 %v1052_v3  ;;  %742 = vmatpush.bf16.msrb.mxu2 %v1063_v7 }
 0x2d8   :  { %663 = vmatpush.bf16.msrb.mxu0 %v1093_v17 }
 0x2d9   :  { %730 = vmatpush.bf16.msrb.mxu1 %v1075_v11  ;;  %743 = vmatpush.bf16.msrb.mxu2 %v1088_v15 }
 0x350   :  { %v453_v30 = vpop.f32.mrf.mxu0  ;;  %v466_v31 = vpop.f32.mrf.mxu1 }
 0x351   :  { %v483_v32 = vadd.f32 %v453_v30, %v437_v28  ;;  %v503_v3 = vadd.f32 %v466_v31, %v438_v29 }
 0x353   :  { %v895_v33 = vmul.f32 -1.442695, %v483_v32  ;;  %v896_v7 = vmul.f32 -1.442695, %v503_v3 }
 0x355   :  { %972 = vpow2.f32 %v895_v33 }
 0x356   :  { %974 = vpow2.f32 %v896_v7 }
 0x357   :  { %v479_v34 = vpop.f32.mrf.mxu2 }
 0x358   :  { %v455_v11 = vpop.f32.mrf.mxu0  ;;  %v468_v35 = vpop.f32.mrf.mxu1  ;;  %v523_v53 = vadd.f32 %v1122_v38, %v479_v34 }
 0x35b   :  { %v973_v15 = vpop.eup %972 }
 0x35c   :  { %v975_v36 = vpop.eup %974  ;;  %v487_v37 = vadd.f32 1.0, %v973_v15 }
 0x35d   :  { %v507_v39 = vadd.f32 1.0, %v975_v36  ;;  %v532_v36 = vld [vmem:[%s1290_s0 + $0x88] sm:$0xff] }
 0x35e   :  { %976 = vrcp.f32 %v487_v37  ;;  %v499_v46 = vand.u32 2147483648, %v487_v37  ;;  %v497_v48 = vand.u32 2147483647, %v487_v37  ;;  %vm493_vm3 = vweird.f32 %v487_v37 }
 0x35f   :  { %978 = vrcp.f32 %v507_v39  ;;  %v481_v40 = vpop.f32.mrf.mxu2  ;;  %v519_v60 = vand.u32 2147483648, %v507_v39  ;;  %vm513_vm7 = vweird.f32 %v507_v39  ;;  %v517_v61 = vand.u32 2147483647, %v507_v39 }
 0x360   :  { %v500_v51 = vor.u32 1.1754944e-38, %v499_v46  ;;  %vm498_vm5 = vcmp.eq.f32.partialorder %v497_v48, 8.507059e+37 }
 0x361   :  { %v520_v0 = vor.u32 1.1754944e-38, %v519_v60  ;;  %vm518_vm10 = vcmp.eq.f32.partialorder %v517_v61, 8.507059e+37 }
 0x364   :  { %v977_v41 = vpop.eup %976 }
 0x365   :  { %v979_v42 = vpop.eup %978  ;;  %v489_v43 = vmul.f32 %v977_v41, %v487_v37  ;;  %vm494_vm2 = vweird.f32 %v977_v41 }
 0x366   :  { %v509_v45 = vmul.f32 %v979_v42, %v507_v39  ;;  %vm495_vm4 = vmor %vm493_vm3, %vm494_vm2  ;;  %vm514_vm6 = vweird.f32 %v979_v42 }
 0x367   :  { %v490_v44 = vsub.f32 1.0, %v489_v43  ;;  %vm515_vm9 = vmor %vm513_vm7, %vm514_vm6 }
 0x368   :  { %v510_v50 = vsub.f32 1.0, %v509_v45 }
 0x369   :  { %v491_v47 = vmul.f32 %v977_v41, %v490_v44 }
 0x36a   :  { %v511_v57 = vmul.f32 %v979_v42, %v510_v50 }
 0x36b   :  { %v492_v49 = vadd.f32 %v977_v41, %v491_v47 }
 0x36c   :  { %v512_v59 = vadd.f32 %v979_v42, %v511_v57 }
 0x36d   :  { %v496_v52 = vsel %vm495_vm4, %v977_v41, %v492_v49 }
 0x36e   :  { %v501_v55 = vsel %vm498_vm5, %v500_v51, %v496_v52  ;;  %v516_v62 = vsel %vm515_vm9, %v979_v42, %v512_v59 }
 0x36f   :  { %v524_v56 = vmul.f32 %v523_v53, %v501_v55  ;;  %v521_v2 = vsel %vm518_vm10, %v520_v0, %v516_v62  ;;  %v623_v53 = vld [vmem:[%s1290_s0 + $0x90] sm:$0xff] }
 0x371   :  { %v525_v58 = vadd.f32 %v524_v56, %v439_v54  ;;  %v624_v54 = vld [vmem:[%s1290_s0 + $0x98] sm:$0xff] }
 0x373   :  { %980 = vtanh.f32 %v525_v58 }
 0x379   :  { %v981_v63 = vpop.eup %980 }
 0x37a   :  { %v527_v1 = vsub.f32 %v1200_v26, %v981_v63 }
 0x37c   :  { %v528_v4 = vmul.f32 %v527_v1, %v521_v2 }
 0x37e   :  { %v1224_v5 = vadd.f32 %v981_v63, %v528_v4 }
 0x380   :  { %v533_v6 = vpack.c.bf16 %v1224_v5, %v1224_v5 }
 0x382   :  { %897 = vmatmul.msk.bf16.vlgmr.msrb.gmra.mxu3 %vm68_vm8, %v533_v6  ;;  %898 = vmatmul.msk.bf16.vlgmr.msra.gmra.mxu0 %vm68_vm8, %v533_v6 }
 0x383   :  { %899 = vmatmul.msk.bf16.vlgmr.msra.gmra.mxu1 %vm68_vm8, %v533_v6  ;;  %755 = vmatpush.bf16.msrb.mxu3 %v1090_v16 }
 0x387   :  { %756 = vmatpush.bf16.msrb.mxu3 %v1093_v17 }
 0x3ff   :  { %v559_v9 = vpop.f32.mrf.mxu0 }
 0x400   :  { %v596_v10 = vadd.f32 %v559_v9, %v531_v8  ;;  %v572_v12 = vpop.f32.mrf.mxu1 }
 0x401   :  { %v616_v11 = vadd.f32 %v1122_v38, %v572_v12 }
 0x402   :  { %v901_v13 = vmul.f32 -1.442695, %v596_v10 }
 0x404   :  { %982 = vpow2.f32 %v901_v13 }
 0x405   :  { %v546_v18 = vpop.f32.mrf.mxu3 }
 0x406   :  { %v576_v19 = vadd.f32 %v546_v18, %v530_v14 }
 0x407   :  { %v561_v20 = vpop.f32.mrf.mxu0 }
 0x408   :  { %v900_v21 = vmul.f32 -1.442695, %v576_v19  ;;  %v574_v16 = vpop.f32.mrf.mxu1 }
 0x40a   :  { %984 = vpow2.f32 %v900_v21  ;;  %v983_v17 = vpop.eup %982 }
 0x40b   :  { %v600_v24 = vadd.f32 1.0, %v983_v17 }
 0x40d   :  { %v548_v22 = vpop.f32.mrf.mxu3  ;;  %v612_v42 = vand.u32 2147483648, %v600_v24  ;;  %vm606_vm0 = vweird.f32 %v600_v24  ;;  %v610_v43 = vand.u32 2147483647, %v600_v24 }
 0x40e   :  { %v625_v22 = vld [vmem:[%s1290_s0 + $0xa0] sm:$0xff] }
 0x40f   :  { %v613_v46 = vor.u32 1.1754944e-38, %v612_v42  ;;  %vm611_vm2 = vcmp.eq.f32.partialorder %v610_v43, 8.507059e+37 }
 0x410   :  { %v985_v23 = vpop.eup %984 }
 0x411   :  { %v580_v25 = vadd.f32 1.0, %v985_v23 }
 0x413   :  { %986 = vrcp.f32 %v580_v25  ;;  %v592_v31 = vand.u32 2147483648, %v580_v25  ;;  %v590_v3 = vand.u32 2147483647, %v580_v25  ;;  %vm586_vm12 = vweird.f32 %v580_v25 }
 0x414   :  { %988 = vrcp.f32 %v600_v24 }
 0x415   :  { %v593_v34 = vor.u32 1.1754944e-38, %v592_v31  ;;  %vm591_vm14 = vcmp.eq.f32.partialorder %v590_v3, 8.507059e+37 }
 0x419   :  { %v987_v26 = vpop.eup %986 }
 0x41a   :  { %v989_v27 = vpop.eup %988  ;;  %v582_v28 = vmul.f32 %v987_v26, %v580_v25  ;;  %vm587_vm11 = vweird.f32 %v987_v26 }
 0x41b   :  { %v602_v30 = vmul.f32 %v989_v27, %v600_v24  ;;  %vm588_vm13 = vmor %vm586_vm12, %vm587_vm11  ;;  %vm607_vm15 = vweird.f32 %v989_v27 }
 0x41c   :  { %v583_v29 = vsub.f32 1.0, %v582_v28  ;;  %vm608_vm1 = vmor %vm606_vm0, %vm607_vm15 }
 0x41d   :  { %v603_v7 = vsub.f32 1.0, %v602_v30 }
 0x41e   :  { %v584_v32 = vmul.f32 %v987_v26, %v583_v29 }
 0x41f   :  { %v604_v39 = vmul.f32 %v989_v27, %v603_v7 }
 0x420   :  { %v585_v33 = vadd.f32 %v987_v26, %v584_v32 }
 0x421   :  { %v605_v41 = vadd.f32 %v989_v27, %v604_v39 }
 0x422   :  { %v589_v35 = vsel %vm588_vm13, %v987_v26, %v585_v33 }
 0x423   :  { %v594_v15 = vsel %vm591_vm14, %v593_v34, %v589_v35  ;;  %v609_v44 = vsel %vm608_vm1, %v989_v27, %v605_v41 }
 0x424   :  { %v617_v37 = vmul.f32 %v616_v11, %v594_v15  ;;  %v614_v48 = vsel %vm611_vm2, %v613_v46, %v609_v44  ;;  %v716_v11 = vld [vmem:[%s1290_s0 + $0xa8] sm:$0xff] }
 0x425   :  { %v928_v44 = vld [vmem:[%s1292_s3 + $0x8] sm:$0xff] }
 0x426   :  { %v618_v40 = vadd.f32 %v617_v37, %v532_v36  ;;  %v717_v37 = vld [vmem:[%s1290_s0 + $0xb0] sm:$0xff]  ;;  %839 = vmatpush.bf16.msra.mxu0 %v928_v44 }
 0x428   :  { %990 = vtanh.f32 %v618_v40 }
 0x42e   :  { %v991_v45 = vpop.eup %990 }
 0x42f   :  { %v620_v47 = vsub.f32 %v1224_v5, %v991_v45 }
 0x431   :  { %v621_v49 = vmul.f32 %v620_v47, %v614_v48  ;;  %v927_v48 = vld [vmem:[%s1292_s3] sm:$0xff] }
 0x432   :  { %840 = vmatpush.bf16.msra.mxu0 %v927_v48 }
 0x433   :  { %v622_v50 = vadd.f32 %v991_v45, %v621_v49 }
 0x435   :  { %v626_v51 = vpack.c.bf16 %v622_v50, %v622_v50 }
 0x437   :  { %902 = vmatmul.msk.bf16.vlgmr.msra.gmra.mxu2 %vm68_vm8, %v626_v51  ;;  %903 = vmatmul.msk.bf16.vlgmr.msra.gmra.mxu3 %vm68_vm8, %v626_v51 }
 0x438   :  { %904 = vmatmul.msk.bf16.vlgmr.msrb.gmra.mxu0 %vm68_vm8, %v626_v51 }
 0x4b5   :  { %v665_v52 = vpop.f32.mrf.mxu0 }
 0x4b6   :  { %v709_v21 = vadd.f32 %v1122_v38, %v665_v52 }
 0x4ba   :  { %v639_v55 = vpop.f32.mrf.mxu2  ;;  %v652_v56 = vpop.f32.mrf.mxu3 }
 0x4bb   :  { %v669_v57 = vadd.f32 %v639_v55, %v623_v53  ;;  %v689_v58 = vadd.f32 %v652_v56, %v624_v54 }
 0x4bd   :  { %v905_v59 = vmul.f32 -1.442695, %v669_v57  ;;  %v906_v60 = vmul.f32 -1.442695, %v689_v58  ;;  %v667_v61 = vpop.f32.mrf.mxu0 }
 0x4bf   :  { %992 = vpow2.f32 %v905_v59 }
 0x4c0   :  { %994 = vpow2.f32 %v906_v60 }
 0x4c2   :  { %v641_v62 = vpop.f32.mrf.mxu2  ;;  %v654_v63 = vpop.f32.mrf.mxu3 }
 0x4c5   :  { %v993_v0 = vpop.eup %992 }
 0x4c6   :  { %v995_v1 = vpop.eup %994  ;;  %v673_v2 = vadd.f32 1.0, %v993_v0 }
 0x4c7   :  { %v693_v4 = vadd.f32 1.0, %v995_v1  ;;  %v718_v1 = vld [vmem:[%s1290_s0 + $0xb8] sm:$0xff] }
 0x4c8   :  { %996 = vrcp.f32 %v673_v2  ;;  %v685_v10 = vand.u32 2147483648, %v673_v2  ;;  %v683_v14 = vand.u32 2147483647, %v673_v2  ;;  %vm679_vm4 = vweird.f32 %v673_v2 }
 0x4c9   :  { %998 = vrcp.f32 %v693_v4  ;;  %v705_v27 = vand.u32 2147483648, %v693_v4  ;;  %vm699_vm9 = vweird.f32 %v693_v4  ;;  %v703_v28 = vand.u32 2147483647, %v693_v4 }
 0x4ca   :  { %v686_v19 = vor.u32 1.1754944e-38, %v685_v10  ;;  %vm684_vm6 = vcmp.eq.f32.partialorder %v683_v14, 8.507059e+37 }
 0x4cb   :  { %v706_v31 = vor.u32 1.1754944e-38, %v705_v27  ;;  %vm704_vm11 = vcmp.eq.f32.partialorder %v703_v28, 8.507059e+37 }
 0x4ce   :  { %v997_v5 = vpop.eup %996 }
 0x4cf   :  { %v999_v6 = vpop.eup %998  ;;  %v675_v8 = vmul.f32 %v997_v5, %v673_v2  ;;  %vm680_vm3 = vweird.f32 %v997_v5 }
 0x4d0   :  { %v695_v12 = vmul.f32 %v999_v6, %v693_v4  ;;  %vm681_vm5 = vmor %vm679_vm4, %vm680_vm3  ;;  %vm700_vm7 = vweird.f32 %v999_v6 }
 0x4d1   :  { %v676_v9 = vsub.f32 1.0, %v675_v8  ;;  %vm701_vm10 = vmor %vm699_vm9, %vm700_vm7 }
 0x4d2   :  { %v696_v20 = vsub.f32 1.0, %v695_v12 }
 0x4d3   :  { %v677_v13 = vmul.f32 %v997_v5, %v676_v9 }
 0x4d4   :  { %v697_v24 = vmul.f32 %v999_v6, %v696_v20 }
 0x4d5   :  { %v678_v18 = vadd.f32 %v997_v5, %v677_v13 }
 0x4d6   :  { %v698_v26 = vadd.f32 %v999_v6, %v697_v24 }
 0x4d7   :  { %v682_v16 = vsel %vm681_vm5, %v997_v5, %v678_v18 }
 0x4d8   :  { %v687_v17 = vsel %vm684_vm6, %v686_v19, %v682_v16  ;;  %v702_v29 = vsel %vm701_vm10, %v999_v6, %v698_v26  ;;  %v931_v16 = vld [vmem:[%s1291_s4] ss:$0 sm:$0xff] }
 0x4d9   :  { %v710_v23 = vmul.f32 %v709_v21, %v687_v17  ;;  %v707_v3 = vsel %vm704_vm11, %v706_v31, %v702_v29 }
 0x4db   :  { %v711_v25 = vadd.f32 %v710_v23, %v625_v22 }
 0x4dd   :  { %1000 = vtanh.f32 %v711_v25 }
 0x4e3   :  { %v1001_v30 = vpop.eup %1000 }
 0x4e4   :  { %v713_v32 = vsub.f32 %v622_v50, %v1001_v30 }
 0x4e6   :  { %v714_v33 = vmul.f32 %v713_v32, %v707_v3 }
 0x4e8   :  { %v1257_v7 = vadd.f32 %v1001_v30, %v714_v33 }
 0x4ea   :  { %v719_v34 = vpack.c.bf16 %v1257_v7, %v1257_v7 }
 0x4ec   :  { %907 = vmatmul.msk.bf16.vlgmr.msrb.gmra.mxu1 %vm68_vm8, %v719_v34  ;;  %908 = vmatmul.msk.bf16.vlgmr.msrb.gmra.mxu2 %vm68_vm8, %v719_v34 }
 0x4ed   :  { %909 = vmatmul.msk.bf16.vlgmr.msrb.gmra.mxu3 %vm68_vm8, %v719_v34 }
 0x569   :  { %v732_v35 = vpop.f32.mrf.mxu1 }
 0x56a   :  { %v762_v15 = vadd.f32 %v732_v35, %v716_v11 }
 0x56c   :  { %v910_v36 = vmul.f32 -1.442695, %v762_v15 }
 0x56e   :  { %1002 = vpow2.f32 %v910_v36 }
 0x56f   :  { %v745_v39 = vpop.f32.mrf.mxu2 }
 0x570   :  { %v782_v40 = vadd.f32 %v745_v39, %v717_v37  ;;  %v758_v41 = vpop.f32.mrf.mxu3 }
 0x571   :  { %v734_v42 = vpop.f32.mrf.mxu1  ;;  %v802_v0 = vadd.f32 %v1122_v38, %v758_v41 }
 0x572   :  { %v911_v43 = vmul.f32 -1.442695, %v782_v40 }
 0x574   :  { %v1003_v45 = vpop.eup %1002  ;;  %1004 = vpow2.f32 %v911_v43 }
 0x575   :  { %v766_v46 = vadd.f32 1.0, %v1003_v45 }
 0x577   :  { %1006 = vrcp.f32 %v766_v46  ;;  %v747_v47 = vpop.f32.mrf.mxu2  ;;  %v778_v55 = vand.u32 2147483648, %v766_v46  ;;  %v776_v57 = vand.u32 2147483647, %v766_v46  ;;  %vm772_vm13 = vweird.f32 %v766_v46 }
 0x578   :  { %v760_v49 = vpop.f32.mrf.mxu3 }
 0x579   :  { %v779_v61 = vor.u32 1.1754944e-38, %v778_v55  ;;  %vm777_vm15 = vcmp.eq.f32.partialorder %v776_v57, 8.507059e+37 }
 0x57a   :  { %v1005_v50 = vpop.eup %1004 }
 0x57b   :  { %v786_v51 = vadd.f32 1.0, %v1005_v50 }
 0x57d   :  { %v1007_v52 = vpop.eup %1006  ;;  %1008 = vrcp.f32 %v786_v51  ;;  %v798_v9 = vand.u32 2147483648, %v786_v51  ;;  %vm792_vm1 = vweird.f32 %v786_v51  ;;  %v796_v10 = vand.u32 2147483647, %v786_v51 }
 0x57e   :  { %v768_v53 = vmul.f32 %v1007_v52, %v766_v46  ;;  %vm773_vm12 = vweird.f32 %v1007_v52 }
 0x57f   :  { %vm774_vm14 = vmor %vm772_vm13, %vm773_vm12  ;;  %v799_v14 = vor.u32 1.1754944e-38, %v798_v9  ;;  %vm797_vm3 = vcmp.eq.f32.partialorder %v796_v10, 8.507059e+37 }
 0x580   :  { %v769_v54 = vsub.f32 1.0, %v768_v53 }
 0x582   :  { %v770_v56 = vmul.f32 %v1007_v52, %v769_v54 }
 0x583   :  { %v1009_v58 = vpop.eup %1008 }
 0x584   :  { %v788_v59 = vmul.f32 %v1009_v58, %v786_v51  ;;  %v771_v60 = vadd.f32 %v1007_v52, %v770_v56  ;;  %vm793_vm0 = vweird.f32 %v1009_v58 }
 0x585   :  { %vm794_vm2 = vmor %vm792_vm1, %vm793_vm0 }
 0x586   :  { %v789_v62 = vsub.f32 1.0, %v788_v59  ;;  %v775_v63 = vsel %vm774_vm14, %v1007_v52, %v771_v60 }
 0x587   :  { %v780_v2 = vsel %vm777_vm15, %v779_v61, %v775_v63 }
 0x588   :  { %v803_v4 = vmul.f32 %v802_v0, %v780_v2  ;;  %v790_v5 = vmul.f32 %v1009_v58, %v789_v62 }
 0x58a   :  { %v804_v6 = vadd.f32 %v803_v4, %v718_v1  ;;  %v791_v8 = vadd.f32 %v1009_v58, %v790_v5 }
 0x58c   :  { %1010 = vtanh.f32 %v804_v6  ;;  %v795_v12 = vsel %vm794_vm2, %v1009_v58, %v791_v8 }
 0x58d   :  { %v800_v18 = vsel %vm797_vm3, %v799_v14, %v795_v12 }
 0x592   :  { %v1011_v13 = vpop.eup %1010 }
 0x593   :  { %v806_v38 = vsub.f32 %v1257_v7, %v1011_v13 }
 0x595   :  { %v807_v19 = vmul.f32 %v806_v38, %v800_v18 }
 0x597   :  { %v808_v20 = vadd.f32 %v1011_v13, %v807_v19 }
 0x599   :  { %v809_v21 = vpack.c.bf16 %v808_v20, %v808_v20 }
 0x59b   :  { %920 = vmatmul.msk.bf16.vlgmr.msra.gmra.mxu0 %vm68_vm8, %v809_v21 }
 0x618   :  { %v842_v17 = vpop.f32.mrf.mxu0 }
 0x619   :  { %v843_v22 = vadd.f32 %v931_v16, %v842_v17 }
 0x61b   :  { %846 = vst [vmem:[%s1293_s5] sm:$0xff] %v843_v22 }
 0x620   :  { %v844_v23 = vpop.f32.mrf.mxu0 }

</bundles_post_ra>
